<compile_context>
chip_gen: v7x
topology: tpu7x:2x2x1
jax: 0.10.0
libtpu: 0.0.40
codegen_flags: <defaults>
</compile_context>

<pallas_src>
import functools

import jax
import jax.numpy as jnp
from jax import lax
from jax.experimental import pallas as pl
from jax.experimental.pallas import tpu as pltpu

EPS = 1e-5
TEMPERATURE = 0.1


def _round_up(n, m):
    return ((n + m - 1) // m) * m


# ---------------------------------------------------------------------------
# Kernel 1: RandomApply(fn, p).forward  (direct spec translation, standalone)
#   fn = brightness scale; gate = (random.random() <= p) drawn host-side.
# Single select-based multiply (no branches), lane-tiled grid.
# ---------------------------------------------------------------------------
def _random_apply_kernel(gate_ref, factor_ref, x_ref, out_ref):
    scale = jnp.where(gate_ref[0] != 0, factor_ref[0], jnp.float32(1.0))
    out_ref[...] = x_ref[...] * scale


def random_apply(x, key, p, factor):
    """RandomApply(scale-by-factor, p).forward as a Pallas kernel."""
    orig_shape = x.shape
    B = orig_shape[0]
    din = 1
    for d in orig_shape[1:]:
        din *= int(d)
    xf = x.reshape(B, din)

    gate = (jax.random.uniform(key) <= p).astype(jnp.int32).reshape(1)
    fac = jnp.full((1,), factor, jnp.float32)

    # lane tile: largest multiple-of-128 divisor of din (lane-dense blocks)
    tl = None
    for cand in (8192, 4096, 2048, 1024, 512, 256, 128):
        if din % cand == 0:
            tl = cand
            break
    if tl is None:
        # TODO(synk): feature dim not a multiple of 128 -> single whole-array block
        tl = din

    out = pl.pallas_call(
        _random_apply_kernel,
        out_shape=jax.ShapeDtypeStruct((B, din), x.dtype),
        grid=(din // tl,),
        in_specs=[pl.BlockSpec(memory_space=pltpu.MemorySpace.SMEM),
                  pl.BlockSpec(memory_space=pltpu.MemorySpace.SMEM),
                  pl.BlockSpec((B, tl), lambda j: (0, j))],
        out_specs=pl.BlockSpec((B, tl), lambda j: (0, j)),
        compiler_params=pltpu.CompilerParams(
            dimension_semantics=("parallel",)),
    )(gate, fac, xf)
    return out.reshape(orig_shape)


# ---------------------------------------------------------------------------
# Kernel 2: fused backbone (K-tiled, B real rows) + per-view scale (RandomApply fold)
#           + SimSiamMLP projector (per-view masked BN) + NT-Xent loss.
# Packed batch layout after finalize: rows [0,B) = query view, [half,half+B) = key
# view, remaining rows zero padding (masked out of BN stats and loss).
# ---------------------------------------------------------------------------
def _simclr_kernel(scale_ref, xf_ref, wc_ref, bc_ref,
                   w1_ref, g1_ref, b1_ref,
                   w2_ref, g2_ref, b2_ref,
                   w3_ref, loss_ref, acc_ref, *, batch, half):
    k = pl.program_id(0)

    @pl.when(k == 0)
    def _():
        acc_ref[...] = jnp.zeros_like(acc_ref)

    # backbone: full-kernel conv == linear over flattened NCHW, K-tiled, f32 accumulate
    acc_ref[...] += jnp.dot(xf_ref[...], wc_ref[...],
                            preferred_element_type=jnp.float32)

    @pl.when(k == pl.num_programs(0) - 1)
    def _():
        bp = 2 * half
        scale_q = scale_ref[0]                 # RandomApply effective per-view scale
        scale_k = scale_ref[1]

        rows_h = lax.broadcasted_iota(jnp.int32, (half, 1), 0)
        m_row = (rows_h < batch).astype(jnp.float32)      # valid rows within one view

        acc = acc_ref[...]
        bc = bc_ref[...]
        # conv(scale*x) == scale*(x@wc)+bc (fn is a pointwise scalar scale)
        hq = jnp.maximum(scale_q * acc + bc, 0.0) * m_row
        hk = jnp.maximum(scale_k * acc + bc, 0.0) * m_row
        h = jnp.concatenate([hq, hk], axis=0)             # (bp, feat)

        rows = lax.broadcasted_iota(jnp.int32, (bp, 1), 0)
        m_q = (rows < batch).astype(jnp.float32)
        m_k = ((rows >= half) & (rows < half + batch)).astype(jnp.float32)
        valid = m_q + m_k
        inv_b = jnp.float32(1.0 / batch)

        def bn(z, gamma=None, beta=None):
            # training-mode BatchNorm1d with *per-view* batch stats (biased variance)
            mu = (m_q * (jnp.sum(z * m_q, axis=0, keepdims=True) * inv_b) +
                  m_k * (jnp.sum(z * m_k, axis=0, keepdims=True) * inv_b))
            d = z - mu
            var = (m_q * (jnp.sum((d * m_q) ** 2, axis=0, keepdims=True) * inv_b) +
                   m_k * (jnp.sum((d * m_k) ** 2, axis=0, keepdims=True) * inv_b))
            zh = d * lax.rsqrt(var + EPS)
            if gamma is not None:
                zh = zh * gamma + beta
            return zh * valid                  # keep pad rows exactly zero

        def mm(a, w_ref):                      # bf16 MXU operands, f32 accumulate
            return jnp.dot(a.astype(jnp.bfloat16), w_ref[...],
                           preferred_element_type=jnp.float32)

        # SimSiamMLP projector
        a1 = jnp.maximum(bn(mm(h, w1_ref), g1_ref[...], b1_ref[...]), 0.0)
        a2 = jnp.maximum(bn(mm(a1, w2_ref), g2_ref[...], b2_ref[...]), 0.0)
        proj = bn(mm(a2, w3_ref))              # final BN, affine=False

        # ---- NT-Xent (fused, f32 softmax/LSE) ----
        inv_t = jnp.float32(1.0 / TEMPERATURE)
        sim = lax.dot_general(proj, proj, (((1,), (1,)), ((), ()))) * inv_t    # (bp, bp)

        r2 = lax.broadcasted_iota(jnp.int32, (bp, bp), 0)
        c2 = lax.broadcasted_iota(jnp.int32, (bp, bp), 1)
        valid_c = (c2 < batch) | ((c2 >= half) & (c2 < half + batch))
        off_diag = valid_c & (r2 != c2)        # removes diagonal, drops pad columns
        sm = jnp.where(off_diag, sim, jnp.float32(-1e30))
        rmax = jnp.max(sm, axis=1, keepdims=True)
        lse = rmax + jnp.log(jnp.sum(jnp.exp(sm - rmax), axis=1, keepdims=True))

        # positive logits: <q_i, k_i> / T, O(n*P) (no n^2 masked gather); half is 8-aligned
        pos_half = jnp.sum(proj[:half] * proj[half:], axis=1, keepdims=True) * inv_t
        pos = jnp.concatenate([pos_half, pos_half], axis=0)                    # (bp, 1)

        loss = jnp.sum((lse - pos) * valid) / jnp.float32(2 * batch)
        loss_ref[...] = jnp.zeros_like(loss_ref) + loss    # lane-dense (1,128) slab


# ---------------------------------------------------------------------------
# Wrappers
# ---------------------------------------------------------------------------
def init_params(key, channels, image_size, feat, hidden, proj):
    din = channels * image_size * image_size
    ks = jax.random.split(key, 4)

    def lin(k, fan_in, shape):
        return jax.random.normal(k, shape, jnp.float32) / jnp.sqrt(fan_in)

    return dict(
        wc=lin(ks[0], din, (din, feat)),           # backbone conv (flattened)
        bc=jnp.zeros((1, feat), jnp.float32),
        w1=lin(ks[1], feat, (feat, hidden)),       # projector Linear 1 (no bias)
        g1=jnp.ones((1, hidden), jnp.float32),
        b1=jnp.zeros((1, hidden), jnp.float32),
        w2=lin(ks[2], hidden, (hidden, hidden)),   # projector Linear 2 (no bias)
        g2=jnp.ones((1, hidden), jnp.float32),
        b2=jnp.zeros((1, hidden), jnp.float32),
        w3=lin(ks[3], hidden, (hidden, proj)),     # projector Linear 3 (no bias)
    )


def prepare_params(params, *, tk=2048):
    """One-time pad + bf16-cast of the weights (done once, not per forward call)."""
    din, feat = params["wc"].shape
    tk = min(tk, _round_up(din, 256))          # multiple of 256 -> always (8,128)-legal
    din_p = _round_up(din, tk)
    wc = jnp.zeros((din_p, feat), jnp.float32).at[:din].set(params["wc"])
    prep = dict(params)
    prep.update(
        wc=wc.astype(jnp.bfloat16),
        w1=params["w1"].astype(jnp.bfloat16),
        w2=params["w2"].astype(jnp.bfloat16),
        w3=params["w3"].astype(jnp.bfloat16),
        din=din, din_p=din_p, tk=tk,
    )
    return prep


def simclr_forward(x, prep, key, *, aug_p=0.3, aug_factor=1.2):
    """x: (B, C, H, W) float32 NCHW.  Returns the scalar NT-Xent loss."""
    B = x.shape[0]
    din = x.shape[1] * x.shape[2] * x.shape[3]
    assert din == prep["din"]
    din_p, tk = prep["din_p"], prep["tk"]

    half = _round_up(B, 8)                     # 8-aligned per-view row count
    bp = 2 * half

    # RandomApply: Bernoulli gate drawn host-side, folded into per-view scalar scales
    k1, k2 = jax.random.split(key)
    gq = jax.random.uniform(k1) <= aug_p
    gk = jax.random.uniform(k2) <= aug_p
    scales = jnp.stack([jnp.where(gq, aug_factor, 1.0),
                        jnp.where(gk, aug_factor, 1.0)]).astype(jnp.float32)

    # backbone input: B real rows only (views materialized in-kernel from the scales)
    xf = x.reshape(B, din).astype(jnp.bfloat16)
    xpad = jnp.zeros((half, din_p), jnp.bfloat16).at[:B, :din].set(xf)

    feat = prep["wc"].shape[1]
    hid = prep["w1"].shape[1]
    proj_dim = prep["w3"].shape[1]

    args = (scales, xpad, prep["wc"], prep["bc"],
            prep["w1"], prep["g1"], prep["b1"],
            prep["w2"], prep["g2"], prep["b2"], prep["w3"])

    flops = (2 * half * din_p * feat
             + 2 * bp * (feat * hid + hid * hid + hid * proj_dim)
             + 2 * bp * bp * proj_dim)
    bytes_accessed = sum(int(a.size) * a.dtype.itemsize for a in args) + 128 * 4
    transcendentals = bp * bp + 8 * bp

    # VMEM budget from the actual block sizes (double-buffered streams + resident weights)
    vmem_est = (2 * half * tk * 2 + 2 * tk * feat * 2
                + feat * hid * 2 + hid * hid * 2 + hid * proj_dim * 2
                + half * feat * 4
                + 8 * bp * hid * 4 + 4 * bp * bp * 4)
    vmem_limit = int(min(100 * 2 ** 20, max(32 * 2 ** 20, 2 * vmem_est)))

    kernel = functools.partial(_simclr_kernel, batch=B, half=half)

    out = pl.pallas_call(
        kernel,
        out_shape=jax.ShapeDtypeStruct((1, 128), jnp.float32),
        grid_spec=pltpu.PrefetchScalarGridSpec(
            num_scalar_prefetch=0,
            grid=(din_p // tk,),
            in_specs=[
                pl.BlockSpec(memory_space=pltpu.MemorySpace.SMEM),   # per-view scales
                pl.BlockSpec((half, tk), lambda k: (0, k)),          # xf: stream K tiles
                pl.BlockSpec((tk, feat), lambda k: (k, 0)),          # wc: stream K tiles
                pl.BlockSpec((1, feat), lambda k: (0, 0)),           # bc  (fetched once)
                pl.BlockSpec((feat, hid), lambda k: (0, 0)),         # w1
                pl.BlockSpec((1, hid), lambda k: (0, 0)),            # g1
                pl.BlockSpec((1, hid), lambda k: (0, 0)),            # b1
                pl.BlockSpec((hid, hid), lambda k: (0, 0)),          # w2
                pl.BlockSpec((1, hid), lambda k: (0, 0)),            # g2
                pl.BlockSpec((1, hid), lambda k: (0, 0)),            # b2
                pl.BlockSpec((hid, proj_dim), lambda k: (0, 0)),     # w3
            ],
            out_specs=pl.BlockSpec((1, 128), lambda k: (0, 0)),
            scratch_shapes=[pltpu.VMEM((half, feat), jnp.float32)],
        ),
        compiler_params=pltpu.CompilerParams(
            dimension_semantics=("arbitrary",),
            vmem_limit_bytes=vmem_limit),
        cost_estimate=pl.CostEstimate(flops=flops,
                                      transcendentals=transcendentals,
                                      bytes_accessed=bytes_accessed),
    )(*args)
    return out[0, 0]


if __name__ == "__main__":
    root = jax.random.PRNGKey(0)
    k_x, k_p, k_aug, k_ra = jax.random.split(root, 4)

    B, C, S = 2, 4, 16                         # batch, channels, image_size
    FEAT, HIDDEN, PROJ = 256, 256, 128         # small hidden (PyTorch default is 4096)

    params = init_params(k_p, C, S, FEAT, HIDDEN, PROJ)
    prep = prepare_params(params, tk=2048)
    x = jax.random.normal(k_x, (B, C, S, S), jnp.float32)

    # spec module on its own: RandomApply(brightness-scale, p=0.3)
    y = random_apply(x, k_ra, 0.3, 1.2)
    y = jax.block_until_ready(y)
    assert y.shape == x.shape and bool(jnp.all(jnp.isfinite(y)))

    # fused SimCLR forward with the RandomApply gates folded in as per-view scales
    loss = simclr_forward(x, prep, k_aug)
    loss = jax.block_until_ready(loss)
    assert loss.shape == () and bool(jnp.isfinite(loss))
    print("KERNEL_OK")
</pallas_src>

<mosaic_0001>
module attributes {stable_mosaic.version = 11 : i64} {
  func.func @_random_apply_kernel(%arg0: i32, %arg1: memref<1xi32, #tpu.memory_space<smem>>, %arg2: memref<1xf32, #tpu.memory_space<smem>>, %arg3: memref<2x1024xf32, #tpu.memory_space<vmem>>, %arg4: memref<2x1024xf32, #tpu.memory_space<vmem>>) attributes {dimension_semantics = [#tpu.dimension_semantics<parallel>], iteration_bounds = array<i64: 1>, scalar_prefetch = 0 : i64, scratch_operands = 0 : i64, tpu.core_type = #tpu.core_type<tc>, window_params = [{transform_indices = @transform_0, window_bounds = array<i64: 1>}, {transform_indices = @transform_1, window_bounds = array<i64: 1>}, {transform_indices = @transform_2, window_bounds = array<i64: 2, 1024>}, {transform_indices = @transform_3, window_bounds = array<i64: 2, 1024>}]} {
    %c0 = arith.constant 0 : index
    %0 = memref.load %arg1[%c0] : memref<1xi32, #tpu.memory_space<smem>>
    %c0_i32 = arith.constant 0 : i32
    %1 = arith.cmpi ne, %0, %c0_i32 : i32
    %c0_0 = arith.constant 0 : index
    %2 = memref.load %arg2[%c0_0] : memref<1xf32, #tpu.memory_space<smem>>
    %cst = arith.constant 1.000000e+00 : f32
    %3 = arith.select %1, %2, %cst : f32
    %c0_1 = arith.constant 0 : index
    %c0_2 = arith.constant 0 : index
    %4 = vector.load %arg3[%c0_1, %c0_2] : memref<2x1024xf32, #tpu.memory_space<vmem>>, vector<2x1024xf32>
    %5 = vector.broadcast %3 : f32 to vector<2x1024xf32>
    %6 = arith.mulf %4, %5 : vector<2x1024xf32>
    %c0_3 = arith.constant 0 : index
    %c0_4 = arith.constant 0 : index
    %7 = vector.load %arg4[%c0_3, %c0_4] : memref<2x1024xf32, #tpu.memory_space<vmem>>, vector<2x1024xf32>
    tpu.vector_store %arg4[%c0_3, %c0_4], %6 {strides = array<i32>} : memref<2x1024xf32, #tpu.memory_space<vmem>>, vector<2x1024xf32>,
    return
  }
  func.func @transform_0(%arg0: i32) -> i32 {
    %c0_i32 = arith.constant 0 : i32
    %c0_i32_0 = arith.constant 0 : i32
    return %c0_i32 : i32
  }
  func.func @transform_1(%arg0: i32) -> i32 {
    %c0_i32 = arith.constant 0 : i32
    %c0_i32_0 = arith.constant 0 : i32
    return %c0_i32 : i32
  }
  func.func @transform_2(%arg0: i32) -> (i32, i32) {
    %c0_i32 = arith.constant 0 : i32
    %c0_i32_0 = arith.constant 0 : i32
    return %c0_i32, %arg0 : i32, i32
  }
  func.func @transform_3(%arg0: i32) -> (i32, i32) {
    %c0_i32 = arith.constant 0 : i32
    %c0_i32_0 = arith.constant 0 : i32
    return %c0_i32, %arg0 : i32, i32
  }
}

</mosaic_0001>

<bundles_post_ra>
// kernel: tpu_custom_call.1
= control target key start
LH: loop header
LB: loop body
LE: loop exit
PB: predicated region body
PF: predicated region fallthrough
CT: control target
= control target key end

     0   :  { %10 = vsyncpa [#allocation5], 0  ;;  %s157_s0 = inlined_call_operand.<no memory space> [shape: s32[1], index: 0, kind: input, shape index: {}]   ;;  %s158_s1 = inlined_call_operand.<no memory space> [shape: f32[1], index: 1, kind: input, shape index: {}]   ;;  %s159_s2 = inlined_call_operand.hbm [shape: f32[2,1024], index: 2, kind: input, shape index: {}]   ;;  %s160_s3 = inlined_call_operand.hbm [shape: f32[2,1024], index: 3, kind: output, shape index: {}]  }
   0x1   :  { %11 = vsyncpa [#allocation6], 0  ;;  %s105_s12 = smov [#allocation4]   ;;  %s57_s16 = scalar_lea.hbm %s159_s2, 256 }
   0x2   :  { %s22_s13 = sshll.u32 %s105_s12, 4  ;;  %p58_p0 = scmp.ne.s32.totalorder %s159_s2, %s57_s16  ;;  %s23_s13 = int_to_ptr.vmem [resolvable:$true] %s22_s13 }
   0x3   :  { %p61_p1 = scmp.lt.u32.totalorder %s57_s16, %s159_s2 }
   0x5   :  { %p63_p2 = pnand %p61_p1, %p58_p0 }
   0x7   :  { %66 = shalt.err (!%p63_p2)
}
   0x8   :  { %s67_s21 = scalar_lea.vmem %s23_s13, 256  ;;  %p72_p4 = scmp.lt.s32.totalorder %s23_s13, %s23_s13 }
   0x9   :  { %p68_p3 = scmp.ne.s32.totalorder %s23_s13, %s67_s21  ;;  %p73_p5 = scmp.lt.s32.totalorder %s67_s21, %s67_s21 }
   0xb   :  { %p74_p6 = por %p73_p5, %p72_p4 }
   0xd   :  { %p75_p7 = pnand %p74_p6, %p68_p3 }
   0xf   :  { %78 = shalt.err (!%p75_p7)
}
  0x10   :  { %25 = dma.hbm_to_vmem [thread:$0]  %s159_s2, 256, %s23_s13, [#allocation5]  }
  0x11   :  { %101 = dma.done.wait [#allocation5], 256  }
  0x12   :  { %102 = vsyncadd [#allocation5], 4294967040  ;;  %p30_p8 = scmp.ne.s32.totalorder %s157_s0, 0  ;;  %s106_s28 = smov [#allocation7]   ;;  %v33_v1 = vld [vmem:[#allocation4] sm:$0xff]  ;;  %v34_v2 = vld [vmem:[#allocation4 + $0x8] sm:$0xff] }
  0x13   :  { %s46_s29 = sshll.u32 %s106_s28, 4  ;;  %s47_s29 = int_to_ptr.vmem [resolvable:$true] %s46_s29 }
  0x14   :  { %s162_s1 = smov (!%p30_p8, %s158_s1), 1.0  ;;  %s79_s2 = scalar_lea.vmem %s47_s29, 256 }
  0x15   :  { %v35_v0 = vstv %s162_s1  ;;  %p80_p9 = scmp.ne.s32.totalorder %s47_s29, %s79_s2  ;;  %p84_p10 = scmp.lt.s32.totalorder %s47_s29, %s47_s29 }
  0x16   :  { %v36_v3 = vmul.f32 %v35_v0, %v33_v1  ;;  %v37_v4 = vmul.f32 %v35_v0, %v34_v2  ;;  %p85_p11 = scmp.lt.s32.totalorder %s79_s2, %s79_s2 }
  0x18   :  { %38 = vst [vmem:[#allocation7] sm:$0xff] %v36_v3  ;;  %39 = vst [vmem:[#allocation7 + $0x8] sm:$0xff] %v37_v4  ;;  %p86_p12 = por %p85_p11, %p84_p10 }
  0x1a   :  { %p87_p13 = pnand %p86_p12, %p80_p9 }
  0x1c   :  { %90 = shalt.err (!%p87_p13)
}
  0x1d   :  { %s91_s1 = scalar_lea.hbm %s160_s3, 256 }
  0x1e   :  { %p92_p0 = scmp.ne.s32.totalorder %s160_s3, %s91_s1  ;;  %p95_p1 = scmp.lt.u32.totalorder %s91_s1, %s160_s3 }
  0x20   :  { %p97_p2 = pnand %p95_p1, %p92_p0 }
  0x22   :  { %100 = shalt.err (!%p97_p2)
}
  0x23   :  { %49 = dma.vmem_to_hbm [thread:$0]  %s47_s29, 256, %s160_s3, [#allocation6]  }
  0x24   :  { %103 = dma.done.wait [#allocation6], 256  }
  0x25   :  { %104 = vsyncadd [#allocation6], 4294967040 }
  0x26   :  { %53 = vsyncpa [#allocation5], 1 }
  0x27   :  { %54 = vsyncpa [#allocation6], 1 }

</bundles_post_ra>
